<compile_context>
chip_gen: v7x
topology: tpu7x:2x2x1
jax: 0.10.0
libtpu: 0.0.40
codegen_flags: <defaults>
</compile_context>

<pallas_src>
import functools

import jax
import jax.numpy as jnp
from jax.experimental import pallas as pl
from jax.experimental.pallas import tpu as pltpu


def _gat_layer_kernel(x_full_ref, x_tile_ref, mask_ref, w_ref,
                      a_src_ref, a_dst_ref, b_ref, out_ref, *,
                      heads, f_out, apply_elu):
    x_full = x_full_ref[...]                       # (N, F_in)   all source nodes
    x_tile = x_tile_ref[...]                       # (TM, F_in)  this tile's dst nodes
    w_all = w_ref[...]                             # (F_in, H*F_out)
    mask_bias = mask_ref[...].astype(jnp.float32)  # (TM, N)  0 or -1e30 (one cast/tile)
    a_src = a_src_ref[...]                         # (H, F_out)
    a_dst = a_dst_ref[...]                         # (H, F_out)
    bias = b_ref[...]                              # (H, F_out)

    # Fused projection for all heads (single wide MXU matmul).
    h_all = jnp.dot(x_full, w_all, preferred_element_type=jnp.float32)   # (N,  H*F)
    h_tile = jnp.dot(x_tile, w_all, preferred_element_type=jnp.float32)  # (TM, H*F)
    h_all_bf = h_all.astype(jnp.bfloat16)          # bf16 operand for aggregation matmul

    for h in range(heads):                         # static unroll over heads
        lo, hi = h * f_out, (h + 1) * f_out
        hh_all = h_all[:, lo:hi]                   # (N,  F_out)
        hh_tile = h_tile[:, lo:hi]                 # (TM, F_out)
        a_s = a_src[h:h + 1, :]                    # (1, F_out)
        a_d = a_dst[h:h + 1, :]                    # (1, F_out)
        b_h = bias[h:h + 1, :]                     # (1, F_out)

        # Per-node attention scores.
        s_dst = jnp.sum(hh_tile * a_d, axis=-1, keepdims=True)            # (TM, 1)
        s_src = jax.lax.dot_general(                                       # (1, N)
            a_s, hh_all, dimension_numbers=(((1,), (1,)), ((), ())),
            preferred_element_type=jnp.float32)

        # e[i, j] = leaky_relu(s_dst[i] + s_src[j], slope=0.2) + mask_bias
        e = s_dst + s_src                                                  # (TM, N)
        e = jnp.maximum(e, 0.2 * e)                # leaky-relu via mul+max
        e = e + mask_bias                          # additive mask (-1e30 off-edge)

        # Masked softmax (f32 element-wise; masked entries underflow to 0).
        m = jnp.max(e, axis=-1, keepdims=True)
        p = jnp.exp(e - m)                                                 # (TM, N)
        denom = jnp.sum(p, axis=-1, keepdims=True)
        inv = pl.reciprocal(jnp.maximum(denom, 1e-30), approx=True)       # (TM, 1)

        # Aggregate messages in bf16 on the MXU (f32 accumulate), then fold the
        # softmax normalization + bias into the epilogue.
        agg = jnp.dot(p.astype(jnp.bfloat16), h_all_bf[:, lo:hi],
                      preferred_element_type=jnp.float32)                  # (TM, F_out)
        out_h = agg * inv + b_h
        if apply_elu:                              # fused ELU epilogue (layer 1)
            out_h = jnp.where(out_h > 0, out_h, jnp.exp(out_h) - 1.0)

        # Static column slice -> heads are stored pre-concatenated, lane-dense.
        out_ref[:, lo:hi] = out_h.astype(out_ref.dtype)
        # TODO(synk): attention dropout (p=0.2) is a no-op in eval mode; omitted.


def _pick_row_tile(n, cap=512):
    # Full extent for small graphs; otherwise a multiple-of-8 cap that keeps
    # (TM, N) tiles double-buffered inside the VMEM budget.
    return n if n <= cap else cap


def gat_layer(x, mask_bias, W, a_src, a_dst, bias, *, apply_elu):
    """One dense GATConv layer. Returns head-concatenated output [N, H*F_out]."""
    H, F_in, F_out = W.shape
    N = x.shape[0]
    tm = _pick_row_tile(N)

    # Fuse per-head weights into one (F_in, H*F_out) matrix; flatten head params.
    W_all = jnp.transpose(W, (1, 0, 2)).reshape(F_in, H * F_out)
    a_src2 = a_src.reshape(H, F_out)
    a_dst2 = a_dst.reshape(H, F_out)
    bias2 = bias.reshape(H, F_out)

    kernel = functools.partial(_gat_layer_kernel, heads=H, f_out=F_out,
                               apply_elu=apply_elu)

    return pl.pallas_call(
        kernel,
        out_shape=jax.ShapeDtypeStruct((N, H * F_out), jnp.float32),
        grid_spec=pltpu.PrefetchScalarGridSpec(
            num_scalar_prefetch=0,
            grid=(pl.cdiv(N, tm),),
            in_specs=[
                pl.BlockSpec((N, F_in), lambda r: (0, 0)),          # x (all sources)
                pl.BlockSpec((tm, F_in), lambda r: (r, 0)),         # x (dst row tile)
                pl.BlockSpec((tm, N), lambda r: (r, 0)),            # additive mask tile
                pl.BlockSpec((F_in, H * F_out), lambda r: (0, 0)),  # fused weights
                pl.BlockSpec((H, F_out), lambda r: (0, 0)),         # att_src
                pl.BlockSpec((H, F_out), lambda r: (0, 0)),         # att_dst
                pl.BlockSpec((H, F_out), lambda r: (0, 0)),         # bias
            ],
            out_specs=pl.BlockSpec((tm, H * F_out), lambda r: (r, 0)),
        ),
        compiler_params=pltpu.CompilerParams(
            dimension_semantics=("parallel",),
            vmem_limit_bytes=48 * 1024 * 1024,
        ),
    )(x, x, mask_bias, W_all, a_src2, a_dst2, bias2)


def edge_index_to_mask_bias(edge_index, num_nodes, dtype=jnp.bfloat16):
    """Additive softmax mask: 0 where an edge (or self-loop) exists, -1e30 elsewhere."""
    src, dst = edge_index[0], edge_index[1]
    adj = jnp.zeros((num_nodes, num_nodes), jnp.float32)
    adj = adj.at[dst, src].set(1.0)
    adj = jnp.maximum(adj, jnp.eye(num_nodes, dtype=jnp.float32))  # self-loops
    return ((1.0 - adj) * jnp.float32(-1e30)).astype(dtype)


def _glorot(key, shape):
    fan_in, fan_out = shape[-2], shape[-1]
    limit = (6.0 / (fan_in + fan_out)) ** 0.5
    return jax.random.uniform(key, shape, jnp.float32, -limit, limit)


def init_params(key, input_dim, hidden_dim, output_dim, heads):
    ks = jax.random.split(key, 6)
    return dict(
        # conv1: GATConv(input_dim, hidden_dim, heads=heads, concat=True)
        W1=_glorot(ks[0], (heads, input_dim, hidden_dim)),
        a_src1=_glorot(ks[1], (heads, 1, hidden_dim)),
        a_dst1=_glorot(ks[2], (heads, 1, hidden_dim)),
        b1=jnp.zeros((heads, 1, hidden_dim), jnp.float32),
        # conv2: GATConv(hidden_dim*heads, output_dim, heads=1, concat=False)
        W2=_glorot(ks[3], (1, heads * hidden_dim, output_dim)),
        a_src2=_glorot(ks[4], (1, 1, output_dim)),
        a_dst2=_glorot(ks[5], (1, 1, output_dim)),
        b2=jnp.zeros((1, 1, output_dim), jnp.float32),
    )


def fraud_graph_attention_forward(x, edge_index, params, num_nodes):
    # Mask is built once (bf16) and reused by both layers.
    mask_bias = edge_index_to_mask_bias(edge_index, num_nodes)

    # conv1 (heads=H, concat=True) with fused ELU epilogue -> (N, H*hidden)
    h1 = gat_layer(x, mask_bias, params["W1"], params["a_src1"],
                   params["a_dst1"], params["b1"], apply_elu=True)
    # TODO(synk): feature dropout (p=0.2) is a no-op in eval mode; omitted.

    # conv2 (heads=1, concat=False -> mean over the single head == identity)
    out = gat_layer(h1, mask_bias, params["W2"], params["a_src2"],
                    params["a_dst2"], params["b2"], apply_elu=False)
    return out                                                     # (N, output_dim)


if __name__ == "__main__":
    key = jax.random.PRNGKey(0)
    N = 16
    input_dim, hidden_dim, output_dim, heads = 8, 16, 4, 2

    k_x, k_e, k_p = jax.random.split(key, 3)
    x = jax.random.normal(k_x, (N, input_dim), dtype=jnp.float32)

    # edge_index [2, E]: ring graph + 8 random edges (row 0 = src, row 1 = dst)
    ring_src = jnp.arange(N, dtype=jnp.int32)
    ring_dst = (jnp.arange(N, dtype=jnp.int32) + 1) % N
    extra_src = jax.random.randint(k_e, (8,), 0, N, dtype=jnp.int32)
    extra_dst = jax.random.randint(jax.random.fold_in(k_e, 1), (8,), 0, N,
                                   dtype=jnp.int32)
    edge_index = jnp.stack([jnp.concatenate([ring_src, extra_src]),
                            jnp.concatenate([ring_dst, extra_dst])])

    params = init_params(k_p, input_dim, hidden_dim, output_dim, heads)

    out = fraud_graph_attention_forward(x, edge_index, params, num_nodes=N)
    out = jax.block_until_ready(out)
    assert out.shape == (N, output_dim), out.shape
    assert bool(jnp.all(jnp.isfinite(out)))
    print("KERNEL_OK")
</pallas_src>

<mosaic_0001>
module attributes {stable_mosaic.version = 11 : i64} {
  func.func @_gat_layer_kernel(%arg0: i32, %arg1: memref<16x8xf32, #tpu.memory_space<vmem>>, %arg2: memref<16x8xf32, #tpu.memory_space<vmem>>, %arg3: memref<16x16xbf16, #tpu.memory_space<vmem>>, %arg4: memref<8x32xf32, #tpu.memory_space<vmem>>, %arg5: memref<2x16xf32, #tpu.memory_space<vmem>>, %arg6: memref<2x16xf32, #tpu.memory_space<vmem>>, %arg7: memref<2x16xf32, #tpu.memory_space<vmem>>, %arg8: memref<16x32xf32, #tpu.memory_space<vmem>>) attributes {dimension_semantics = [#tpu.dimension_semantics<parallel>], iteration_bounds = array<i64: 1>, scalar_prefetch = 0 : i64, scratch_operands = 0 : i64, tpu.core_type = #tpu.core_type<tc>, window_params = [{pipeline_mode = #tpu.pipeline_mode<synchronous>, transform_indices = @transform_0, window_bounds = array<i64: 16, 8>}, {transform_indices = @transform_1, window_bounds = array<i64: 16, 8>}, {transform_indices = @transform_2, window_bounds = array<i64: 16, 16>}, {pipeline_mode = #tpu.pipeline_mode<synchronous>, transform_indices = @transform_3, window_bounds = array<i64: 8, 32>}, {pipeline_mode = #tpu.pipeline_mode<synchronous>, transform_indices = @transform_4, window_bounds = array<i64: 2, 16>}, {pipeline_mode = #tpu.pipeline_mode<synchronous>, transform_indices = @transform_5, window_bounds = array<i64: 2, 16>}, {pipeline_mode = #tpu.pipeline_mode<synchronous>, transform_indices = @transform_6, window_bounds = array<i64: 2, 16>}, {transform_indices = @transform_7, window_bounds = array<i64: 16, 32>}]} {
    %c0 = arith.constant 0 : index
    %c0_0 = arith.constant 0 : index
    %0 = vector.load %arg1[%c0, %c0_0] : memref<16x8xf32, #tpu.memory_space<vmem>>, vector<16x8xf32>
    %c0_1 = arith.constant 0 : index
    %c0_2 = arith.constant 0 : index
    %1 = vector.load %arg2[%c0_1, %c0_2] : memref<16x8xf32, #tpu.memory_space<vmem>>, vector<16x8xf32>
    %c0_3 = arith.constant 0 : index
    %c0_4 = arith.constant 0 : index
    %2 = vector.load %arg4[%c0_3, %c0_4] : memref<8x32xf32, #tpu.memory_space<vmem>>, vector<8x32xf32>
    %c0_5 = arith.constant 0 : index
    %c0_6 = arith.constant 0 : index
    %3 = vector.load %arg3[%c0_5, %c0_6] : memref<16x16xbf16, #tpu.memory_space<vmem>>, vector<16x16xbf16>
    %4 = arith.extf %3 : vector<16x16xbf16> to vector<16x16xf32>
    %c0_7 = arith.constant 0 : index
    %c0_8 = arith.constant 0 : index
    %5 = vector.load %arg5[%c0_7, %c0_8] : memref<2x16xf32, #tpu.memory_space<vmem>>, vector<2x16xf32>
    %c0_9 = arith.constant 0 : index
    %c0_10 = arith.constant 0 : index
    %6 = vector.load %arg6[%c0_9, %c0_10] : memref<2x16xf32, #tpu.memory_space<vmem>>, vector<2x16xf32>
    %c0_11 = arith.constant 0 : index
    %c0_12 = arith.constant 0 : index
    %7 = vector.load %arg7[%c0_11, %c0_12] : memref<2x16xf32, #tpu.memory_space<vmem>>, vector<2x16xf32>
    %cst = arith.constant dense<0.000000e+00> : vector<16x32xf32>
    %8 = tpu.matmul %0, %2, %cst {dimension_numbers = #tpu.dot_dimension_numbers<[1], [0], [0], [1], [0, 0, 1, 1], [], []>} : vector<16x8xf32>, vector<8x32xf32>, vector<16x32xf32> -> vector<16x32xf32>
    %cst_13 = arith.constant dense<0.000000e+00> : vector<16x32xf32>
    %9 = tpu.matmul %1, %2, %cst_13 {dimension_numbers = #tpu.dot_dimension_numbers<[1], [0], [0], [1], [0, 0, 1, 1], [], []>} : vector<16x8xf32>, vector<8x32xf32>, vector<16x32xf32> -> vector<16x32xf32>
    %10 = arith.truncf %8 : vector<16x32xf32> to vector<16x32xbf16>
    %11 = vector.extract_strided_slice %8 {offsets = [0, 0], sizes = [16, 16], strides = [1, 1]} : vector<16x32xf32> to vector<16x16xf32>
    %12 = vector.extract_strided_slice %9 {offsets = [0, 0], sizes = [16, 16], strides = [1, 1]} : vector<16x32xf32> to vector<16x16xf32>
    %13 = vector.extract_strided_slice %5 {offsets = [0, 0], sizes = [1, 16], strides = [1, 1]} : vector<2x16xf32> to vector<1x16xf32>
    %14 = vector.extract_strided_slice %6 {offsets = [0, 0], sizes = [1, 16], strides = [1, 1]} : vector<2x16xf32> to vector<1x16xf32>
    %15 = vector.extract_strided_slice %7 {offsets = [0, 0], sizes = [1, 16], strides = [1, 1]} : vector<2x16xf32> to vector<1x16xf32>
    %16 = vector.broadcast %14 : vector<1x16xf32> to vector<16x16xf32>
    %17 = arith.mulf %12, %16 : vector<16x16xf32>
    %cst_14 = arith.constant dense<0.000000e+00> : vector<16xf32>
    %18 = vector.multi_reduction <add>, %17, %cst_14 [1] : vector<16x16xf32> to vector<16xf32>
    %19 = vector.shape_cast %18 : vector<16xf32> to vector<16x1xf32>
    %cst_15 = arith.constant dense<0.000000e+00> : vector<1x16xf32>
    %20 = tpu.matmul %13, %11, %cst_15 {dimension_numbers = #tpu.dot_dimension_numbers<[1], [1], [0], [0], [0, 0, 1, 0], [], []>} : vector<1x16xf32>, vector<16x16xf32>, vector<1x16xf32> -> vector<1x16xf32>
    %21 = vector.broadcast %19 : vector<16x1xf32> to vector<16x16xf32>
    %22 = vector.broadcast %20 : vector<1x16xf32> to vector<16x16xf32>
    %23 = arith.addf %21, %22 : vector<16x16xf32>
    %cst_16 = arith.constant 2.000000e-01 : f32
    %24 = vector.broadcast %cst_16 : f32 to vector<16x16xf32>
    %25 = arith.mulf %24, %23 : vector<16x16xf32>
    %26 = arith.maximumf %23, %25 : vector<16x16xf32>
    %27 = arith.addf %26, %4 : vector<16x16xf32>
    %cst_17 = arith.constant dense<0xFF800000> : vector<16xf32>
    %28 = vector.multi_reduction <maximumf>, %27, %cst_17 [1] : vector<16x16xf32> to vector<16xf32>
    %29 = vector.shape_cast %28 : vector<16xf32> to vector<16x1xf32>
    %30 = vector.broadcast %29 : vector<16x1xf32> to vector<16x16xf32>
    %31 = arith.subf %27, %30 : vector<16x16xf32>
    %32 = math.exp %31 : vector<16x16xf32>
    %cst_18 = arith.constant dense<0.000000e+00> : vector<16xf32>
    %33 = vector.multi_reduction <add>, %32, %cst_18 [1] : vector<16x16xf32> to vector<16xf32>
    %34 = vector.shape_cast %33 : vector<16xf32> to vector<16x1xf32>
    %cst_19 = arith.constant 1.000000e-30 : f32
    %35 = vector.broadcast %cst_19 : f32 to vector<16x1xf32>
    %36 = arith.maximumf %34, %35 : vector<16x1xf32>
    %37 = tpu.reciprocal %36 {approx = true} : vector<16x1xf32> -> vector<16x1xf32>
    %38 = arith.truncf %32 : vector<16x16xf32> to vector<16x16xbf16>
    %39 = vector.extract_strided_slice %10 {offsets = [0, 0], sizes = [16, 16], strides = [1, 1]} : vector<16x32xbf16> to vector<16x16xbf16>
    %cst_20 = arith.constant dense<0.000000e+00> : vector<16x16xf32>
    %40 = tpu.matmul %38, %39, %cst_20 {dimension_numbers = #tpu.dot_dimension_numbers<[1], [0], [0], [1], [0, 0, 1, 1], [], []>} : vector<16x16xbf16>, vector<16x16xbf16>, vector<16x16xf32> -> vector<16x16xf32>
    %41 = vector.broadcast %37 : vector<16x1xf32> to vector<16x16xf32>
    %42 = arith.mulf %40, %41 : vector<16x16xf32>
    %43 = vector.broadcast %15 : vector<1x16xf32> to vector<16x16xf32>
    %44 = arith.addf %42, %43 : vector<16x16xf32>
    %cst_21 = arith.constant 0.000000e+00 : f32
    %45 = vector.broadcast %cst_21 : f32 to vector<16x16xf32>
    %46 = arith.cmpf ogt, %44, %45 : vector<16x16xf32>
    %47 = math.exp %44 : vector<16x16xf32>
    %cst_22 = arith.constant 1.000000e+00 : f32
    %48 = vector.broadcast %cst_22 : f32 to vector<16x16xf32>
    %49 = arith.subf %47, %48 : vector<16x16xf32>
    %50 = arith.select %46, %44, %49 : vector<16x16xi1>, vector<16x16xf32>
    %c0_23 = arith.constant 0 : index
    %c0_24 = arith.constant 0 : index
    %51 = vector.load %arg8[%c0_23, %c0_24] : memref<16x32xf32, #tpu.memory_space<vmem>>, vector<16x16xf32>
    tpu.vector_store %arg8[%c0_23, %c0_24], %50 {strides = array<i32>} : memref<16x32xf32, #tpu.memory_space<vmem>>, vector<16x16xf32>,
    %52 = vector.extract_strided_slice %8 {offsets = [0, 16], sizes = [16, 16], strides = [1, 1]} : vector<16x32xf32> to vector<16x16xf32>
    %53 = vector.extract_strided_slice %9 {offsets = [0, 16], sizes = [16, 16], strides = [1, 1]} : vector<16x32xf32> to vector<16x16xf32>
    %54 = vector.extract_strided_slice %5 {offsets = [1, 0], sizes = [1, 16], strides = [1, 1]} : vector<2x16xf32> to vector<1x16xf32>
    %55 = vector.extract_strided_slice %6 {offsets = [1, 0], sizes = [1, 16], strides = [1, 1]} : vector<2x16xf32> to vector<1x16xf32>
    %56 = vector.extract_strided_slice %7 {offsets = [1, 0], sizes = [1, 16], strides = [1, 1]} : vector<2x16xf32> to vector<1x16xf32>
    %57 = vector.broadcast %55 : vector<1x16xf32> to vector<16x16xf32>
    %58 = arith.mulf %53, %57 : vector<16x16xf32>
    %cst_25 = arith.constant dense<0.000000e+00> : vector<16xf32>
    %59 = vector.multi_reduction <add>, %58, %cst_25 [1] : vector<16x16xf32> to vector<16xf32>
    %60 = vector.shape_cast %59 : vector<16xf32> to vector<16x1xf32>
    %cst_26 = arith.constant dense<0.000000e+00> : vector<1x16xf32>
    %61 = tpu.matmul %54, %52, %cst_26 {dimension_numbers = #tpu.dot_dimension_numbers<[1], [1], [0], [0], [0, 0, 1, 0], [], []>} : vector<1x16xf32>, vector<16x16xf32>, vector<1x16xf32> -> vector<1x16xf32>
    %62 = vector.broadcast %60 : vector<16x1xf32> to vector<16x16xf32>
    %63 = vector.broadcast %61 : vector<1x16xf32> to vector<16x16xf32>
    %64 = arith.addf %62, %63 : vector<16x16xf32>
    %cst_27 = arith.constant 2.000000e-01 : f32
    %65 = vector.broadcast %cst_27 : f32 to vector<16x16xf32>
    %66 = arith.mulf %65, %64 : vector<16x16xf32>
    %67 = arith.maximumf %64, %66 : vector<16x16xf32>
    %68 = arith.addf %67, %4 : vector<16x16xf32>
    %cst_28 = arith.constant dense<0xFF800000> : vector<16xf32>
    %69 = vector.multi_reduction <maximumf>, %68, %cst_28 [1] : vector<16x16xf32> to vector<16xf32>
    %70 = vector.shape_cast %69 : vector<16xf32> to vector<16x1xf32>
    %71 = vector.broadcast %70 : vector<16x1xf32> to vector<16x16xf32>
    %72 = arith.subf %68, %71 : vector<16x16xf32>
    %73 = math.exp %72 : vector<16x16xf32>
    %cst_29 = arith.constant dense<0.000000e+00> : vector<16xf32>
    %74 = vector.multi_reduction <add>, %73, %cst_29 [1] : vector<16x16xf32> to vector<16xf32>
    %75 = vector.shape_cast %74 : vector<16xf32> to vector<16x1xf32>
    %cst_30 = arith.constant 1.000000e-30 : f32
    %76 = vector.broadcast %cst_30 : f32 to vector<16x1xf32>
    %77 = arith.maximumf %75, %76 : vector<16x1xf32>
    %78 = tpu.reciprocal %77 {approx = true} : vector<16x1xf32> -> vector<16x1xf32>
    %79 = arith.truncf %73 : vector<16x16xf32> to vector<16x16xbf16>
    %80 = vector.extract_strided_slice %10 {offsets = [0, 16], sizes = [16, 16], strides = [1, 1]} : vector<16x32xbf16> to vector<16x16xbf16>
    %cst_31 = arith.constant dense<0.000000e+00> : vector<16x16xf32>
    %81 = tpu.matmul %79, %80, %cst_31 {dimension_numbers = #tpu.dot_dimension_numbers<[1], [0], [0], [1], [0, 0, 1, 1], [], []>} : vector<16x16xbf16>, vector<16x16xbf16>, vector<16x16xf32> -> vector<16x16xf32>
    %82 = vector.broadcast %78 : vector<16x1xf32> to vector<16x16xf32>
    %83 = arith.mulf %81, %82 : vector<16x16xf32>
    %84 = vector.broadcast %56 : vector<1x16xf32> to vector<16x16xf32>
    %85 = arith.addf %83, %84 : vector<16x16xf32>
    %cst_32 = arith.constant 0.000000e+00 : f32
    %86 = vector.broadcast %cst_32 : f32 to vector<16x16xf32>
    %87 = arith.cmpf ogt, %85, %86 : vector<16x16xf32>
    %88 = math.exp %85 : vector<16x16xf32>
    %cst_33 = arith.constant 1.000000e+00 : f32
    %89 = vector.broadcast %cst_33 : f32 to vector<16x16xf32>
    %90 = arith.subf %88, %89 : vector<16x16xf32>
    %91 = arith.select %87, %85, %90 : vector<16x16xi1>, vector<16x16xf32>
    %c0_34 = arith.constant 0 : index
    %c16 = arith.constant 16 : index
    %92 = vector.load %arg8[%c0_34, %c16] : memref<16x32xf32, #tpu.memory_space<vmem>>, vector<16x16xf32>
    tpu.vector_store %arg8[%c0_34, %c16], %91 {strides = array<i32>} : memref<16x32xf32, #tpu.memory_space<vmem>>, vector<16x16xf32>,
    return
  }
  func.func @transform_0(%arg0: i32) -> (i32, i32) {
    %c0_i32 = arith.constant 0 : i32
    %c0_i32_0 = arith.constant 0 : i32
    %c0_i32_1 = arith.constant 0 : i32
    return %c0_i32, %c0_i32_0 : i32, i32
  }
  func.func @transform_1(%arg0: i32) -> (i32, i32) {
    %c0_i32 = arith.constant 0 : i32
    %c0_i32_0 = arith.constant 0 : i32
    return %arg0, %c0_i32 : i32, i32
  }
  func.func @transform_2(%arg0: i32) -> (i32, i32) {
    %c0_i32 = arith.constant 0 : i32
    %c0_i32_0 = arith.constant 0 : i32
    return %arg0, %c0_i32 : i32, i32
  }
  func.func @transform_3(%arg0: i32) -> (i32, i32) {
    %c0_i32 = arith.constant 0 : i32
    %c0_i32_0 = arith.constant 0 : i32
    %c0_i32_1 = arith.constant 0 : i32
    return %c0_i32, %c0_i32_0 : i32, i32
  }
  func.func @transform_4(%arg0: i32) -> (i32, i32) {
    %c0_i32 = arith.constant 0 : i32
    %c0_i32_0 = arith.constant 0 : i32
    %c0_i32_1 = arith.constant 0 : i32
    return %c0_i32, %c0_i32_0 : i32, i32
  }
  func.func @transform_5(%arg0: i32) -> (i32, i32) {
    %c0_i32 = arith.constant 0 : i32
    %c0_i32_0 = arith.constant 0 : i32
    %c0_i32_1 = arith.constant 0 : i32
    return %c0_i32, %c0_i32_0 : i32, i32
  }
  func.func @transform_6(%arg0: i32) -> (i32, i32) {
    %c0_i32 = arith.constant 0 : i32
    %c0_i32_0 = arith.constant 0 : i32
    %c0_i32_1 = arith.constant 0 : i32
    return %c0_i32, %c0_i32_0 : i32, i32
  }
  func.func @transform_7(%arg0: i32) -> (i32, i32) {
    %c0_i32 = arith.constant 0 : i32
    %c0_i32_0 = arith.constant 0 : i32
    return %arg0, %c0_i32 : i32, i32
  }
}

</mosaic_0001>

<bundles_post_ra>
// kernel: tpu_custom_call.1
= control target key start
LH: loop header
LB: loop body
LE: loop exit
PB: predicated region body
PF: predicated region fallthrough
CT: control target
= control target key end

     0   :  { %vm40_vm0 = vcmask 64512   ;;  %s924_s0 = inlined_call_operand.vmem [shape: f32[16,8], index: 0, kind: input, shape index: {}]   ;;  %s925_s1 = inlined_call_operand.vmem [shape: f32[16,8], index: 1, kind: input, shape index: {}]   ;;  %s926_s2 = inlined_call_operand.vmem [shape: bf16[16,16], index: 2, kind: input, shape index: {}]   ;;  %s927_s3 = inlined_call_operand.vmem [shape: f32[8,32], index: 3, kind: input, shape index: {}]   ;;  %s928_s4 = inlined_call_operand.vmem [shape: f32[2,16], index: 4, kind: input, shape index: {}]   ;;  %s929_s5 = inlined_call_operand.vmem [shape: f32[2,16], index: 5, kind: input, shape index: {}]   ;;  %s930_s6 = inlined_call_operand.vmem [shape: f32[2,16], index: 6, kind: input, shape index: {}]   ;;  %s931_s7 = inlined_call_operand.hbm [shape: f32[16,32], index: 7, kind: output, shape index: {}]  }
   0x1   :  { %v32_v0 = vld [vmem:[%s927_s3] sm:$0xff]  ;;  %v29_v3 = vld [vmem:[%s924_s0 + $0x8] sm:$0xff] }
   0x2   :  { %v28_v1 = vld [vmem:[%s924_s0] sm:$0xff]  ;;  %664 = vmatprep.subr.mxu0 %v32_v0  ;;  %669 = vmatprep.subr.mxu1 %v32_v0  ;;  %v31_v4 = vld [vmem:[%s925_s1 + $0x8] sm:$0xff] }
   0x3   :  { %v30_v2 = vld [vmem:[%s925_s1] sm:$0xff] }
   0x4   :  { %12 = vsyncpa [#allocation3], 0  ;;  %665 = vmatpush3.msra.mxu0 %v32_v0  ;;  %666 = vmatprep.mubr.msk.f32.mxu0 %vm40_vm0, %v28_v1  ;;  %v769_v5 = vmov 0.0|0.0   ;;  %v770_v6 = vmov 0.0   ;;  %vm771_vm1 = vmmov 0   ;;  %v204_v7 = vlaneseq  ;;  %s772_s11 = smov 112  }
   0x5   :  { %670 = vmatpush3.msra.mxu1 %v32_v0  ;;  %671 = vmatprep.mubr.msk.f32.mxu1 %vm40_vm0, %v30_v2  ;;  %v38_v10 = vld [vmem:[%s929_s5] sm:$0x3]  ;;  %vm210_vm2 = vcmask 130048   ;;  %vm609_vm8 = vcmask 261248  }
   0x6   :  { %667 = vmatmul.mubr.msk.f32.vlgmr.msra.gmra.mrb[0].mxu0 %vm40_vm0, %v29_v3  ;;  %672 = vmatmul.mubr.msk.f32.vlgmr.msra.gmra.mrb[0].mxu1 %vm40_vm0, %v31_v4  ;;  %v837_v8 = vshrl.u32 %v204_v7, 7  ;;  %vm848_vm3 = vmpackc.low %vm210_vm2, %vm210_vm2  ;;  %v37_v23 = vld [vmem:[%s928_s4] sm:$0x3] }
   0x7   :  { %700 = vmatprep.subr.bf16.mxu0 %v769_v5  ;;  %681 = vmatprep.subr.bf16.mxu1 %v770_v6  ;;  %v872_v29 = vld [vmem:[%s926_s2] sm:$0xff]   ;;  %s773_s2 = smov 16   ;;  %v419_v60 = vrot.slane %v37_v23, 1 }
   0x8   :  { %678 = vmatprep.mubr.msk.f32.mxu0 %vm771_vm1, %v770_v6  ;;  %683 = vmatprep.mubr.msk.bf16.mxu1 %vm771_vm1, %v770_v6  ;;  %v840_v9 = vsub.s32 0, %v837_v8  ;;  %v646_v34 = vunpack.c.l.bf16 %v872_v29  ;;  %v647_v36 = vunpack.c.h.bf16 %v872_v29  ;;  %v397_v42 = vsub.s32 1, %v837_v8 }
   0xa   :  { %v207_v11 = vrot.slane %v38_v10, %v840_v9  ;;  %v398_v43 = vrot.slane %v38_v10, %v397_v42 }
  0xd9   :  { %v668_v12 = vpop.f32.mrb[0].mxu0  ;;  %v673_v13 = vpop.f32.mrb[0].mxu1 }
  0xda   :  { %v113_v14 = vpop.f32.mrb[1].mxu0  ;;  %v194_v15 = vpop.f32.mrb[1].mxu1  ;;  %v209_v17 = vmul.f32 %v673_v13, %v207_v11 }
  0xdb   :  { %v716_v18 = vpack.i.bf16 %v668_v12, %v113_v14  ;;  %v852_v19 = vpack.c.bf16 %v668_v12, %v113_v14  ;;  %v208_v20 = vmul.f32 %v207_v11, %v194_v15 }
  0xdc   :  { %v214_v22 = vsel %vm210_vm2, %v209_v17, 0.0 }
  0xdd   :  { %703 = vmatpush3.bf16.xpose.msk.msra.mxu0 %vm848_vm3, %v852_v19  ;;  %682 = vmatpush3.bf16.msra.mxu1 %v852_v19  ;;  %v211_v21 = vsel %vm210_vm2, %v208_v20, 0.0 }
  0xde   :  { %212 = vadd.xlane.f32.xlu0 %v211_v21  ;;  %704 = vmatprep.subr.bf16.mxu1 %v769_v5 }
  0xdf   :  { %694 = vmatprep.subr.bf16.mxu0 %v770_v6 }
  0xe2   :  { %215 = vadd.xlane.f32.xlu0 %v214_v22 }
  0xe4   :  { %679 = vmatmul.mubr.msk.f32.vlgmr.msra.gmra.mrb[2].mxu0 %vm210_vm2, %v37_v23 }
  0xe5   :  { %696 = vmatprep.mubr.msk.bf16.mxu0 %vm771_vm1, %v770_v6 }
  0xf8   :  { %717 = vrot.lane.b32.xlu0 %v716_v18, %s772_s11 }
 0x16b   :  { %v213_v24 = vpop.xlane.xlu0 %212 }
 0x16f   :  { %v216_v28 = vpop.xlane.xlu0 %215 }
 0x173   :  { %v718_v53 = vpop.permute.xlu0 %717 }
 0x174   :  { %v720_v54 = vunpack.i.h.bf16 %v718_v53  ;;  %v719_v55 = vunpack.i.l.bf16 %v718_v53 }
 0x176   :  { %v705_v59 = vpack.c.bf16 %v720_v54, %v719_v55 }
 0x1b7   :  { %v292_v25 = vpop.f32.mrb[2].mxu0 }
 0x1b8   :  { %v299_v26 = vrot.slane %v292_v25, %v840_v9  ;;  %v680_v27 = vpop.f32.mrb[3].mxu0 }
 0x1ba   :  { %v300_v30 = vadd.f32 %v299_v26, %v213_v24  ;;  %v301_v31 = vadd.f32 %v299_v26, %v216_v28 }
 0x1bc   :  { %v302_v32 = vmul.f32 0.2, %v300_v30  ;;  %v303_v33 = vmul.f32 0.2, %v301_v31 }
 0x1be   :  { %v304_v35 = vmax.f32 %v300_v30, %v302_v32  ;;  %v305_v37 = vmax.f32 %v301_v31, %v303_v33 }
 0x1c0   :  { %v306_v38 = vadd.f32 %v646_v34, %v304_v35  ;;  %v307_v40 = vadd.f32 %v647_v36, %v305_v37 }
 0x1c2   :  { %v308_v39 = vsel %vm210_vm2, %v306_v38, -inf  ;;  %v311_v41 = vsel %vm210_vm2, %v307_v40, -inf }
 0x1c3   :  { %309 = vmax.xlane.f32.xlu1 %v308_v39 }
 0x1c7   :  { %312 = vmax.xlane.f32.xlu1 %v311_v41 }
 0x1d8   :  { %400 = vrot.lane.b32.xlu1 %v398_v43, %s773_s2  ;;  %v39_v43 = vld [vmem:[%s930_s6] sm:$0x3]  ;;  %s774_s6 = smov [#allocation2]  }
 0x1d9   :  { %s617_s15 = sshll.u32 %s774_s6, 4  ;;  %s618_s15 = int_to_ptr.vmem [resolvable:$true] %s617_s15 }
 0x1da   :  { %s745_s16 = scalar_lea.vmem %s618_s15, 256  ;;  %p750_p1 = scmp.lt.s32.totalorder %s618_s15, %s618_s15 }
 0x1db   :  { %p746_p0 = scmp.ne.s32.totalorder %s618_s15, %s745_s16  ;;  %p751_p2 = scmp.lt.s32.totalorder %s745_s16, %s745_s16 }
 0x1dd   :  { %p752_p3 = por %p751_p2, %p750_p1 }
 0x1df   :  { %p753_p4 = pnand %p752_p3, %p746_p0 }
 0x250   :  { %v310_v44 = vpop.xlane.xlu1 %309 }
 0x251   :  { %v314_v45 = vsub.f32 %v306_v38, %v310_v44  ;;  %v380_v44 = vrot.slane %v39_v43, %v840_v9 }
 0x253   :  { %v316_v46 = vmul.f32 1.442695, %v314_v45 }
 0x254   :  { %v313_v47 = vpop.xlane.xlu1 %312 }
 0x255   :  { %v315_v48 = vsub.f32 %v307_v40, %v313_v47  ;;  %721 = vpow2.f32 %v316_v46 }
 0x257   :  { %v318_v49 = vmul.f32 1.442695, %v315_v48 }
 0x258   :  { %v401_v50 = vpop.permute.xlu1 %400 }
 0x259   :  { %723 = vpow2.f32 %v318_v49  ;;  %v403_v51 = vmul.f32 %v401_v50, %v194_v15  ;;  %v404_v52 = vmul.f32 %v673_v13, %v401_v50 }
 0x25b   :  { %407 = vrot.lane.b32.xlu1 %v403_v51, %s772_s11 }
 0x25f   :  { %409 = vrot.lane.b32.xlu1 %v404_v52, %s772_s11  ;;  %v722_v56 = vpop.eup %721 }
 0x263   :  { %v724_v57 = vpop.eup %723 }
 0x264   :  { %v330_v58 = vpack.c.bf16 %v724_v57, %v722_v56  ;;  %v323_v35 = vsel %vm210_vm2, %v724_v57, 0.0 }
 0x266   :  { %684 = vmatmul.mubr.msk.bf16.vlgmr.msra.gmra.mrb[4].mxu1 %vm210_vm2, %v330_v58 }
 0x267   :  { %707 = vmatpush3.bf16.xpose.msk.msra.mxu1 %vm848_vm3, %v705_v59  ;;  %691 = vmatprep.mubr.msk.f32.mxu1 %vm771_vm1, %v770_v6 }
 0x26e   :  { %692 = vmatmul.mubr.msk.f32.vlgmr.msra.gmra.mrb[2].mxu1 %vm210_vm2, %v419_v60  ;;  %v588_v60 = vrot.slane %v39_v43, %v397_v42 }
 0x2cd   :  { %v408_v61 = vpop.permute.xlu1 %407 }
 0x2ce   :  { %v413_v62 = vsel %vm210_vm2, %v408_v61, 0.0 }
 0x2cf   :  { %414 = vadd.xlane.f32.xlu0 %v413_v62 }
 0x2d1   :  { %v410_v63 = vpop.permute.xlu1 %409 }
 0x2d2   :  { %v416_v0 = vsel %vm210_vm2, %v410_v63, 0.0 }
 0x2d3   :  { %417 = vadd.xlane.f32.xlu1 %v416_v0 }
 0x339   :  { %v368_v1 = vpop.f32.mrb[4].mxu1 }
 0x33a   :  { %v685_v2 = vpop.f32.mrb[5].mxu1 }
 0x33b   :  { %v371_v3 = vpop.f32.mrb[6].mxu1 }
 0x33c   :  { %v686_v4 = vpop.f32.mrb[7].mxu1 }
 0x341   :  { %v496_v5 = vpop.f32.mrb[2].mxu1 }
 0x342   :  { %v693_v7 = vpop.f32.mrb[3].mxu1  ;;  %v503_v10 = vrot.slane %v496_v5, %v840_v9 }
 0x35c   :  { %v415_v6 = vpop.xlane.xlu0 %414 }
 0x35d   :  { %v504_v11 = vadd.f32 %v503_v10, %v415_v6 }
 0x35f   :  { %v506_v12 = vmul.f32 0.2, %v504_v11 }
 0x360   :  { %v418_v13 = vpop.xlane.xlu1 %417 }
 0x361   :  { %v508_v14 = vmax.f32 %v504_v11, %v506_v12  ;;  %v505_v15 = vadd.f32 %v503_v10, %v418_v13 }
 0x363   :  { %v507_v16 = vmul.f32 0.2, %v505_v15  ;;  %v510_v17 = vadd.f32 %v646_v34, %v508_v14 }
 0x365   :  { %v509_v18 = vmax.f32 %v505_v15, %v507_v16  ;;  %v512_v20 = vsel %vm210_vm2, %v510_v17, -inf }
 0x366   :  { %513 = vmax.xlane.f32.xlu0 %v512_v20 }
 0x367   :  { %v511_v21 = vadd.f32 %v647_v36, %v509_v18 }
 0x369   :  { %v515_v22 = vsel %vm210_vm2, %v511_v21, -inf }
 0x36a   :  { %516 = vmax.xlane.f32.xlu0 %v515_v22 }
 0x380   :  { %536 = vrot.lane.b32.xlu0 %v852_v19, %s772_s11  ;;  %v320_v19 = vsel %vm210_vm2, %v722_v56, 0.0 }
 0x3f3   :  { %v514_v23 = vpop.xlane.xlu0 %513 }
 0x3f4   :  { %v518_v24 = vsub.f32 %v510_v17, %v514_v23 }
 0x3f6   :  { %v520_v25 = vmul.f32 1.442695, %v518_v24 }
 0x3f7   :  { %v517_v26 = vpop.xlane.xlu0 %516 }
 0x3f8   :  { %725 = vpow2.f32 %v520_v25  ;;  %v519_v27 = vsub.f32 %v511_v21, %v517_v26 }
 0x3fa   :  { %v522_v28 = vmul.f32 1.442695, %v519_v27 }
 0x3fb   :  { %v537_v29 = vpop.permute.xlu0 %536 }
 0x3fc   :  { %727 = vpow2.f32 %v522_v28  ;;  %695 = vmatpush3.bf16.msra.mxu0 %v537_v29 }
 0x402   :  { %v726_v30 = vpop.eup %725 }
 0x403   :  { %v524_v31 = vsel %vm210_vm2, %v726_v30, 0.0 }
 0x404   :  { %525 = vadd.xlane.f32.xlu1 %v524_v31 }
 0x406   :  { %v728_v32 = vpop.eup %727 }
 0x407   :  { %v527_v33 = vsel %vm210_vm2, %v728_v32, 0.0  ;;  %v534_v34 = vpack.c.bf16 %v728_v32, %v726_v30 }
 0x408   :  { %528 = vadd.xlane.f32.xlu1 %v527_v33 }
 0x409   :  { %697 = vmatmul.mubr.msk.bf16.vlgmr.msra.gmra.mrb[4].mxu0 %vm210_vm2, %v534_v34 }
 0x40c   :  { %321 = vadd.xlane.f32.xlu1 %v320_v19 }
 0x410   :  { %324 = vadd.xlane.f32.xlu1 %v323_v35 }
 0x491   :  { %v526_v36 = vpop.xlane.xlu1 %525 }
 0x492   :  { %v530_v58 = vmax.f32 %v526_v36, 1e-30 }
 0x495   :  { %v529_v37 = vpop.xlane.xlu1 %528 }
 0x496   :  { %v531_v59 = vmax.f32 %v529_v37, 1e-30 }
 0x499   :  { %v322_v38 = vpop.xlane.xlu1 %321 }
 0x49a   :  { %v326_v39 = vmax.f32 %v322_v38, 1e-30 }
 0x49c   :  { %729 = vrcp.f32 %v326_v39 }
 0x49d   :  { %v325_v40 = vpop.xlane.xlu1 %324 }
 0x49e   :  { %v327_v41 = vmax.f32 %v325_v40, 1e-30 }
 0x4a0   :  { %731 = vrcp.f32 %v327_v41 }
 0x4a6   :  { %v730_v45 = vpop.eup %729 }
 0x4a7   :  { %v375_v46 = vmul.f32 %v730_v45, %v368_v1 }
 0x4a9   :  { %v381_v47 = vadd.f32 %v380_v44, %v375_v46 }
 0x4aa   :  { %v732_v48 = vpop.eup %731 }
 0x4ab   :  { %v376_v49 = vmul.f32 %v732_v48, %v371_v3  ;;  %v385_v50 = vmul.f32 1.442695, %v381_v47  ;;  %vm383_vm4 = vcmp.gt.f32.partialorder %v381_v47, 0.0 }
 0x4ad   :  { %v382_v51 = vadd.f32 %v380_v44, %v376_v49  ;;  %733 = vpow2.f32 %v385_v50 }
 0x4af   :  { %v387_v52 = vmul.f32 1.442695, %v382_v51  ;;  %vm384_vm5 = vcmp.gt.f32.partialorder %v382_v51, 0.0 }
 0x4b1   :  { %735 = vpow2.f32 %v387_v52 }
 0x4b2   :  { %737 = vrcp.f32 %v530_v58 }
 0x4b3   :  { %739 = vrcp.f32 %v531_v59 }
 0x4b7   :  { %v734_v53 = vpop.eup %733 }
 0x4b8   :  { %v636_v54 = vadd.f32 -1.0, %v734_v53 }
 0x4ba   :  { %v391_v55 = vsel %vm383_vm4, %v381_v47, %v636_v54 }
 0x4bb   :  { %v736_v56 = vpop.eup %735  ;;  %393 = vst.msk [vmem:[#allocation2] sm:$0xff] %vm210_vm2, %v391_v55 }
 0x4bc   :  { %v637_v57 = vadd.f32 -1.0, %v736_v56  ;;  %v738_v61 = vpop.eup %737 }
 0x4bd   :  { %v740_v1 = vpop.eup %739 }
 0x4be   :  { %v392_v9 = vsel %vm384_vm5, %v382_v51, %v637_v57 }
 0x4bf   :  { %394 = vst.msk [vmem:[#allocation2 + $0x8] sm:$0xff] %vm210_vm2, %v392_v9 }
 0x4dc   :  { %v576_v62 = vpop.f32.mrb[4].mxu0 }
 0x4dd   :  { %v583_v63 = vmul.f32 %v738_v61, %v576_v62  ;;  %v698_v0 = vpop.f32.mrb[5].mxu0 }
 0x4de   :  { %v579_v2 = vpop.f32.mrb[6].mxu0 }
 0x4df   :  { %v589_v3 = vadd.f32 %v588_v60, %v583_v63  ;;  %v584_v4 = vmul.f32 %v740_v1, %v579_v2  ;;  %v699_v5 = vpop.f32.mrb[7].mxu0 }
 0x4e1   :  { %v593_v7 = vmul.f32 1.442695, %v589_v3  ;;  %v590_v10 = vadd.f32 %v588_v60, %v584_v4  ;;  %vm591_vm6 = vcmp.gt.f32.partialorder %v589_v3, 0.0 }
 0x4e3   :  { %741 = vpow2.f32 %v593_v7  ;;  %v595_v6 = vmul.f32 1.442695, %v590_v10  ;;  %vm592_vm7 = vcmp.gt.f32.partialorder %v590_v10, 0.0 }
 0x4e5   :  { %743 = vpow2.f32 %v595_v6 }
 0x4ed   :  { %v742_v11 = vpop.eup %741 }
 0x4ee   :  { %v642_v12 = vadd.f32 -1.0, %v742_v11 }
 0x4ef   :  { %v744_v13 = vpop.eup %743 }
 0x4f0   :  { %v599_v8 = vsel %vm591_vm6, %v589_v3, %v642_v12  ;;  %v643_v42 = vadd.f32 -1.0, %v744_v13 }
 0x4f1   :  { %603 = vrot.lane.b32.xlu1 %v599_v8, %s773_s2 }
 0x4f2   :  { %v600_v14 = vsel %vm592_vm7, %v590_v10, %v643_v42 }
 0x4f3   :  { %605 = vrot.lane.b32.xlu0 %v600_v14, %s773_s2 }
 0x563   :  { %v604_v15 = vpop.permute.xlu1 %603 }
 0x564   :  { %610 = vst.msk [vmem:[#allocation2] sm:$0xff] %vm609_vm8, %v604_v15 }
 0x565   :  { %v606_v16 = vpop.permute.xlu0 %605 }
 0x566   :  { %611 = vst.msk [vmem:[#allocation2 + $0x8] sm:$0xff] %vm609_vm8, %v606_v16 }
 0x567   :  { %756 = shalt.err (!%p753_p4)
}
 0x568   :  { %s757_s19 = scalar_lea.hbm %s931_s7, 256 }
 0x569   :  { %p758_p5 = scmp.ne.s32.totalorder %s931_s7, %s757_s19  ;;  %p761_p6 = scmp.lt.u32.totalorder %s757_s19, %s931_s7 }
 0x56b   :  { %p763_p7 = pnand %p761_p6, %p758_p5 }
 0x56d   :  { %766 = shalt.err (!%p763_p7)
}
 0x56e   :  { %s775_s24 = smov 128   ;;  %s776_s25 = smov 8  }
 0x56f   :  { %623 = dma.vmem_to_hbm [thread:$0]  %s618_s15, 256, %s931_s7, [#allocation3], %s775_s24, %s775_s24, %s776_s25  }
 0x570   :  { %767 = dma.done.wait [#allocation3], 256  }
 0x571   :  { %768 = vsyncadd [#allocation3], 4294967040 }
 0x572   :  { %627 = vsyncpa [#allocation3], 1 }

</bundles_post_ra>
